<compile_context>
chip_gen: v7x
topology: tpu7x:2x2x1
jax: 0.10.0
libtpu: 0.0.40
codegen_flags: <defaults>
</compile_context>

<pallas_src>
import functools

import jax
import jax.numpy as jnp
from jax.experimental import pallas as pl
from jax.experimental.pallas import tpu as pltpu


def _round_up(x, m):
    return ((x + m - 1) // m) * m


def _ring_loss_kernel(radius_ref, x_ref, sqerr_ref, *, n_valid, tile_m, mask_rows):
    # (tm, d) feature tile; all math in f32 on the VPU (bf16 inputs cast here).
    x = x_ref[...].astype(jnp.float32)
    sq_norm = jnp.sum(x * x, axis=1, keepdims=True)        # (tm, 1) lane reduce
    diff = jnp.sqrt(sq_norm) - radius_ref[0]               # radius scalar (SMEM)
    sq_err = diff * diff                                    # (tm, 1)

    if mask_rows:
        # Trailing partial block: rows >= n_valid hold out-of-bounds garbage
        # (possibly NaN/Inf).  Select (not multiply) so garbage cannot leak.
        i = pl.program_id(0)
        row = i * tile_m + jax.lax.broadcasted_iota(jnp.int32, (tile_m, 1), 0)
        sq_err = jnp.where(row < n_valid, sq_err, 0.0)

    sqerr_ref[...] = sq_err


def ring_loss(x, radius, weight_ring=1.0, *, tile_m=None):
    """x: (n, feat_dim) features; radius: scalar (the learned ring radius)."""
    n, d = x.shape
    itemsize = int(jnp.dtype(x.dtype).itemsize)
    # Sublane multiple per dtype: 8 for f32, 16 for bf16, 32 for int8/fp8.
    sub = max(8, 32 // max(itemsize, 1))
    row_bytes = max(d * itemsize, 1)

    if tile_m is None:
        target_bytes = 2 << 20          # ~2 MiB feature tile: >85% of HBM roofline
        cap_bytes = 12 << 20            # double-buffered input stays well under VMEM
        tm = (target_bytes // row_bytes) // sub * sub
        tm_cap = (cap_bytes // (2 * row_bytes)) // sub * sub
        tm = max(sub, min(tm, tm_cap))
    else:
        tm = max(sub, _round_up(int(tile_m), sub))
    tm = min(tm, _round_up(n, sub))     # never larger than the (aligned) batch

    num_tiles = pl.cdiv(n, tm)
    mask_rows = (n % tm) != 0

    radius_arr = jnp.asarray(radius, dtype=jnp.float32).reshape(1)

    kernel = functools.partial(
        _ring_loss_kernel, n_valid=n, tile_m=tm, mask_rows=mask_rows)

    partials = pl.pallas_call(
        kernel,
        out_shape=jax.ShapeDtypeStruct((num_tiles * tm, 1), jnp.float32),
        grid=(num_tiles,),
        in_specs=[
            # radius: whole (1,) array in SMEM every step (scalar parameter).
            pl.BlockSpec(memory_space=pltpu.SMEM),
            # features: one (tm, d) row tile per grid step, auto-pipelined.
            pl.BlockSpec((tm, d), lambda i: (i, 0)),
        ],
        # Per-tile partial squared errors -> independent output blocks, so the
        # grid axis is parallel (megacore sharding on v7x).
        out_specs=pl.BlockSpec((tm, 1), lambda i: (i, 0)),
        compiler_params=pltpu.CompilerParams(
            dimension_semantics=("parallel",),
        ),
    )(radius_arr, x)

    # Tiny O(n) reduce + scale in the wrapper; masked rows are already zero.
    return jnp.sum(partials) * (jnp.float32(weight_ring) / jnp.float32(n))


def _reference(x, radius, weight_ring=1.0):
    norm = jnp.sqrt(jnp.sum(x.astype(jnp.float32) ** 2, axis=1))
    return jnp.mean((norm - jnp.float32(radius)) ** 2) * jnp.float32(weight_ring)


if __name__ == "__main__":
    key = jax.random.PRNGKey(0)

    # Small shapes consistent with the module: batch=8 feature vectors of dim 32.
    n, feat_dim = 8, 32
    x = jax.random.normal(key, (n, feat_dim), dtype=jnp.float32)
    radius = 1.0          # nn.Parameter init: torch.ones(1)
    weight_ring = 1.0

    loss = ring_loss(x, radius, weight_ring)
    jax.block_until_ready(loss)
    ref = _reference(x, radius, weight_ring)
    assert jnp.allclose(loss, ref, rtol=1e-5, atol=1e-5), (loss, ref)

    # Unaligned batch + multiple row tiles: exercises the trailing partial
    # block mask and the per-tile partial outputs (no wrapper-side padding).
    k2 = jax.random.PRNGKey(1)
    x2 = jax.random.normal(k2, (50, 96), dtype=jnp.float32)
    loss2 = ring_loss(x2, 1.5, 0.7, tile_m=16)
    jax.block_until_ready(loss2)
    ref2 = _reference(x2, 1.5, 0.7)
    assert jnp.allclose(loss2, ref2, rtol=1e-5, atol=1e-5), (loss2, ref2)

    # bf16 features: exercises dtype-aware sublane rounding (tm multiple of 16)
    # and in-kernel f32 cast while streaming half the HBM bytes.
    k3 = jax.random.PRNGKey(2)
    x3 = jax.random.normal(k3, (40, 64), dtype=jnp.bfloat16)
    loss3 = ring_loss(x3, 1.2, 0.5)
    jax.block_until_ready(loss3)
    ref3 = _reference(x3, 1.2, 0.5)
    assert jnp.allclose(loss3, ref3, rtol=1e-4, atol=1e-4), (loss3, ref3)

    print("KERNEL_OK")
</pallas_src>

<mosaic_0001>
module attributes {stable_mosaic.version = 11 : i64} {
  func.func @_ring_loss_kernel(%arg0: i32, %arg1: memref<1xf32, #tpu.memory_space<smem>>, %arg2: memref<8x32xf32, #tpu.memory_space<vmem>>, %arg3: memref<8x1xf32, #tpu.memory_space<vmem>>) attributes {dimension_semantics = [#tpu.dimension_semantics<parallel>], iteration_bounds = array<i64: 1>, scalar_prefetch = 0 : i64, scratch_operands = 0 : i64, tpu.core_type = #tpu.core_type<tc>, window_params = [{transform_indices = @transform_0, window_bounds = array<i64: 1>}, {transform_indices = @transform_1, window_bounds = array<i64: 8, 32>}, {transform_indices = @transform_2, window_bounds = array<i64: 8, 1>}]} {
    %c0 = arith.constant 0 : index
    %c0_0 = arith.constant 0 : index
    %0 = vector.load %arg2[%c0, %c0_0] : memref<8x32xf32, #tpu.memory_space<vmem>>, vector<8x32xf32>
    %1 = arith.mulf %0, %0 : vector<8x32xf32>
    %cst = arith.constant dense<0.000000e+00> : vector<8xf32>
    %2 = vector.multi_reduction <add>, %1, %cst [1] : vector<8x32xf32> to vector<8xf32>
    %3 = vector.shape_cast %2 : vector<8xf32> to vector<8x1xf32>
    %4 = math.sqrt %3 : vector<8x1xf32>
    %c0_1 = arith.constant 0 : index
    %5 = memref.load %arg1[%c0_1] : memref<1xf32, #tpu.memory_space<smem>>
    %6 = vector.broadcast %5 : f32 to vector<8x1xf32>
    %7 = arith.subf %4, %6 : vector<8x1xf32>
    %8 = arith.mulf %7, %7 : vector<8x1xf32>
    %c0_2 = arith.constant 0 : index
    %c0_3 = arith.constant 0 : index
    %9 = vector.load %arg3[%c0_2, %c0_3] : memref<8x1xf32, #tpu.memory_space<vmem>>, vector<8x1xf32>
    tpu.vector_store %arg3[%c0_2, %c0_3], %8 {strides = array<i32>} : memref<8x1xf32, #tpu.memory_space<vmem>>, vector<8x1xf32>,
    return
  }
  func.func @transform_0(%arg0: i32) -> i32 {
    %c0_i32 = arith.constant 0 : i32
    %c0_i32_0 = arith.constant 0 : i32
    return %c0_i32 : i32
  }
  func.func @transform_1(%arg0: i32) -> (i32, i32) {
    %c0_i32 = arith.constant 0 : i32
    %c0_i32_0 = arith.constant 0 : i32
    return %arg0, %c0_i32 : i32, i32
  }
  func.func @transform_2(%arg0: i32) -> (i32, i32) {
    %c0_i32 = arith.constant 0 : i32
    %c0_i32_0 = arith.constant 0 : i32
    return %arg0, %c0_i32 : i32, i32
  }
}

</mosaic_0001>

<bundles_post_ra>
// kernel: tpu_custom_call.1
= control target key start
LH: loop header
LB: loop body
LE: loop exit
PB: predicated region body
PF: predicated region fallthrough
CT: control target
= control target key end

     0   :  { %8 = vsyncpa [#allocation4], 0  ;;  %s75_s9 = smov [#allocation3]   ;;  %s109_s0 = inlined_call_operand.<no memory space> [shape: f32[1], index: 0, kind: input, shape index: {}]   ;;  %s110_s1 = inlined_call_operand.hbm [shape: f32[8,32], index: 1, kind: input, shape index: {}]   ;;  %s111_s2 = inlined_call_operand.vmem [shape: f32[8,1], index: 2, kind: output, shape index: {}]  }
   0x1   :  { %s17_s10 = sshll.u32 %s75_s9, 4  ;;  %s51_s13 = scalar_lea.hbm %s110_s1, 128  ;;  %s18_s10 = int_to_ptr.vmem [resolvable:$true] %s17_s10 }
   0x2   :  { %p52_p0 = scmp.ne.s32.totalorder %s110_s1, %s51_s13  ;;  %p55_p1 = scmp.lt.u32.totalorder %s51_s13, %s110_s1 }
   0x4   :  { %p57_p2 = pnand %p55_p1, %p52_p0 }
   0x6   :  { %60 = shalt.err (!%p57_p2)
}
   0x7   :  { %s61_s18 = scalar_lea.vmem %s18_s10, 128  ;;  %p66_p4 = scmp.lt.s32.totalorder %s18_s10, %s18_s10 }
   0x8   :  { %p62_p3 = scmp.ne.s32.totalorder %s18_s10, %s61_s18  ;;  %p67_p5 = scmp.lt.s32.totalorder %s61_s18, %s61_s18 }
   0xa   :  { %p68_p6 = por %p67_p5, %p66_p4 }
   0xc   :  { %p69_p7 = pnand %p68_p6, %p62_p3 }
   0xe   :  { %72 = shalt.err (!%p69_p7)
}
   0xf   :  { %20 = dma.hbm_to_vmem [thread:$0]  %s110_s1, 128, %s18_s10, [#allocation4]  }
  0x10   :  { %73 = dma.done.wait [#allocation4], 128  }
  0x11   :  { %74 = vsyncadd [#allocation4], 4294967168  ;;  %v24_v0 = vld [vmem:[#allocation3] sm:$0xff]  ;;  %vm26_vm0 = vcmask 261120   ;;  %v38_v7 = vstv %s109_s0  ;;  %vm41_vm3 = vcmask 7168  }
  0x12   :  { %v25_v1 = vmul.f32 %v24_v0, %v24_v0 }
  0x14   :  { %v27_v2 = vsel %vm26_vm0, %v25_v1, 0.0 }
  0x15   :  { %28 = vadd.xlane.f32.xlu0 %v27_v2 }
  0xa2   :  { %v29_v3 = vpop.xlane.xlu0 %28 }
  0xa3   :  { %49 = vrsqrt.f32 %v29_v3  ;;  %vm32_vm1 = vcmp.eq.f32.partialorder %v29_v3, inf  ;;  %v35_v6 = vand.u32 2147483648, %v29_v3  ;;  %vm34_vm2 = vcmp.eq.f32.partialorder %v29_v3, 0.0 }
  0xad   :  { %v50_v4 = vpop.eup %49 }
  0xae   :  { %v31_v5 = vmul.f32 %v50_v4, %v29_v3 }
  0xb0   :  { %v33_v8 = vsel %vm32_vm1, %v29_v3, %v31_v5 }
  0xb1   :  { %v36_v9 = vsel %vm34_vm2, %v35_v6, %v33_v8 }
  0xb2   :  { %v39_v10 = vsub.f32 %v36_v9, %v38_v7 }
  0xb4   :  { %v40_v11 = vmul.f32 %v39_v10, %v39_v10 }
  0xb6   :  { %42 = vst.msk [vmem:[%s111_s2] sm:$0xff] %vm41_vm3, %v40_v11 }
  0xb7   :  { %47 = vsyncpa [#allocation4], 1 }

</bundles_post_ra>
